<compile_context>
chip_gen: v7x
topology: tpu7x:2x2x1
jax: 0.10.0
libtpu: 0.0.40
codegen_flags: <defaults>
</compile_context>

<pallas_src>
import jax
import jax.numpy as jnp
from jax.experimental import pallas as pl
from jax.experimental.pallas import tpu as pltpu

BN_EPS = 1e-5


def _make_fused_mlp_kernel(out_channel, n_batch, hw):
    """Fused kernel for len(out_channel)-1 x (1x1 conv -> batch-stat BN -> ReLU).

    Ref layout:
      x_ref : (Cin0, N*HW)          f32   channels-major, lane-dense input slab
      w_ref : (sum(Cout), 128)      f32   packed, zero-padded conv weights
      o_ref : (N, Cout_last, HW)    f32
    """
    num_layers = len(out_channel) - 1
    row_off = []
    off = 0
    for li in range(num_layers):
        row_off.append(off)
        off += out_channel[li + 1]

    def kernel(x_ref, w_ref, o_ref):
        inv_cnt = 1.0 / float(n_batch * hw)
        cur = x_ref[...]                                        # (Cin0, N*HW)

        for li in range(num_layers):
            cin, cout = out_channel[li], out_channel[li + 1]
            r0 = row_off[li]
            w = w_ref[r0:r0 + cout, 0:cin]                      # (Cout, Cin) static slice

            # 1x1 conv == channel matmul over all N*HW pixels at once.
            # (Conv bias omitted: exactly cancelled by BN's batch-mean subtraction.)
            y = jnp.dot(w, cur, preferred_element_type=jnp.float32)   # (Cout, N*HW)

            # Batch statistics over all N*HW positions, single pass per channel.
            s = jnp.sum(y, axis=1, keepdims=True)               # (Cout, 1)
            ss = jnp.sum(y * y, axis=1, keepdims=True)           # (Cout, 1)
            mean = s * inv_cnt
            var = jnp.maximum(ss * inv_cnt - mean * mean, 0.0)    # biased var, clamped

            # BN (gamma=1, beta=0) + ReLU folded into one FMA over the big slab.
            scale = jax.lax.rsqrt(var + BN_EPS)                  # (Cout, 1)
            shift = -mean * scale                                # (Cout, 1)
            cur = jnp.maximum(y * scale + shift, 0.0)            # (Cout, N*HW)

        # Split back into per-batch slabs; 256-wide 128-aligned lane slices
        # => unmasked stores, and the wrapper only needs a free reshape.
        for n in range(n_batch):
            o_ref[n, :, :] = cur[:, n * hw:(n + 1) * hw].astype(o_ref.dtype)

    return kernel


def init_mlp_block_params(key, out_channel):
    """One packed (sum(Cout), 128) f32 weight slab.

    Row block l holds the (Cout_l, Cin_l) 1x1-conv weight (pre-transposed for
    W @ X), zero-padded to 128 lanes.  Conv bias is not generated (cancelled
    by batch-mean BN); gamma/beta are not stored (always 1/0 for a fresh BN).
    """
    num_layers = len(out_channel) - 1
    rows = sum(out_channel[1:])
    lanes = max(128, ((max(out_channel[:-1]) + 127) // 128) * 128)
    slab = jnp.zeros((rows, lanes), jnp.float32)
    r = 0
    for idx in range(num_layers):
        cin, cout = out_channel[idx], out_channel[idx + 1]
        key, kw = jax.random.split(key)
        bound = 1.0 / float(cin) ** 0.5        # PyTorch kaiming-uniform fan_in bound
        w_t = jax.random.uniform(kw, (cout, cin), jnp.float32, -bound, bound)
        slab = slab.at[r:r + cout, 0:cin].set(w_t)
        r += cout
    return slab


def mlp_block_forward(x_nchw, w_slab, out_channel):
    """x_nchw: (N, C, H, W) float32 — same layout as the PyTorch module."""
    n, c, h, w = x_nchw.shape
    hw = h * w
    # Channels-major lane-dense slab (Cin, N*HW): pure layout plumbing in XLA.
    x_cm = jnp.transpose(x_nchw.reshape(n, c, hw), (1, 0, 2)).reshape(c, n * hw)
    c_out = out_channel[-1]

    vmem = pl.BlockSpec(memory_space=pltpu.MemorySpace.VMEM)
    out = pl.pallas_call(
        _make_fused_mlp_kernel(tuple(out_channel), n, hw),
        out_shape=jax.ShapeDtypeStruct((n, c_out, hw), jnp.float32),
        in_specs=[vmem, vmem],
        out_specs=vmem,
    )(x_cm, w_slab)

    return out.reshape(n, c_out, h, w)


def _reference_forward(x_nchw, w_slab, out_channel):
    """Pure-JAX reference of the PyTorch forward (training-mode BN)."""
    x = x_nchw
    r = 0
    for idx in range(len(out_channel) - 1):
        cin, cout = out_channel[idx], out_channel[idx + 1]
        wt = w_slab[r:r + cout, :cin]
        r += cout
        y = jnp.einsum("oc,nchw->nohw", wt, x,
                       precision=jax.lax.Precision.HIGHEST)
        mean = jnp.mean(y, axis=(0, 2, 3), keepdims=True)
        var = jnp.mean((y - mean) ** 2, axis=(0, 2, 3), keepdims=True)
        x = jnp.maximum((y - mean) * jax.lax.rsqrt(var + BN_EPS), 0.0)
    return x


if __name__ == "__main__":
    key = jax.random.PRNGKey(0)
    k_x, k_p = jax.random.split(key)

    # MLPBlock(out_channel=[4, 32, 16], dimension=2, with_bn=True)
    out_channel = [4, 32, 16]
    w_slab = init_mlp_block_params(k_p, out_channel)

    # Small NCHW input consistent with the 2-D conv path.
    x = jax.random.normal(k_x, (2, 4, 16, 16), dtype=jnp.float32)

    @jax.jit
    def forward(xx, ww):
        return mlp_block_forward(xx, ww, out_channel)

    y = forward(x, w_slab)
    jax.block_until_ready(y)
    assert y.shape == (2, 16, 16, 16), y.shape  # (N, out_channel[-1], H, W)

    y_ref = _reference_forward(x, w_slab, out_channel)
    assert jnp.allclose(y, y_ref, rtol=1e-3, atol=1e-3), float(
        jnp.max(jnp.abs(y - y_ref)))

    print("KERNEL_OK")
</pallas_src>

<mosaic_0001>
module attributes {stable_mosaic.version = 11 : i64} {
  func.func @kernel(%arg0: memref<4x512xf32, #tpu.memory_space<vmem>>, %arg1: memref<48x128xf32, #tpu.memory_space<vmem>>, %arg2: memref<2x16x256xf32, #tpu.memory_space<vmem>>) attributes {dimension_semantics = [], scalar_prefetch = 0 : i64, scratch_operands = 0 : i64, tpu.core_type = #tpu.core_type<tc>} {
    %c0 = arith.constant 0 : index
    %c0_0 = arith.constant 0 : index
    %0 = vector.load %arg0[%c0, %c0_0] : memref<4x512xf32, #tpu.memory_space<vmem>>, vector<4x512xf32>
    %c0_1 = arith.constant 0 : index
    %c0_2 = arith.constant 0 : index
    %1 = vector.load %arg1[%c0_1, %c0_2] : memref<48x128xf32, #tpu.memory_space<vmem>>, vector<32x4xf32>
    %cst = arith.constant dense<0.000000e+00> : vector<32x512xf32>
    %2 = tpu.matmul %1, %0, %cst {dimension_numbers = #tpu.dot_dimension_numbers<[1], [0], [0], [1], [0, 0, 1, 1], [], []>} : vector<32x4xf32>, vector<4x512xf32>, vector<32x512xf32> -> vector<32x512xf32>
    %cst_3 = arith.constant dense<0.000000e+00> : vector<32xf32>
    %3 = vector.multi_reduction <add>, %2, %cst_3 [1] : vector<32x512xf32> to vector<32xf32>
    %4 = vector.shape_cast %3 : vector<32xf32> to vector<32x1xf32>
    %5 = arith.mulf %2, %2 : vector<32x512xf32>
    %cst_4 = arith.constant dense<0.000000e+00> : vector<32xf32>
    %6 = vector.multi_reduction <add>, %5, %cst_4 [1] : vector<32x512xf32> to vector<32xf32>
    %7 = vector.shape_cast %6 : vector<32xf32> to vector<32x1xf32>
    %cst_5 = arith.constant 0.001953125 : f32
    %8 = vector.broadcast %cst_5 : f32 to vector<32x1xf32>
    %9 = arith.mulf %4, %8 : vector<32x1xf32>
    %cst_6 = arith.constant 0.001953125 : f32
    %10 = vector.broadcast %cst_6 : f32 to vector<32x1xf32>
    %11 = arith.mulf %7, %10 : vector<32x1xf32>
    %12 = arith.mulf %9, %9 : vector<32x1xf32>
    %13 = arith.subf %11, %12 : vector<32x1xf32>
    %cst_7 = arith.constant 0.000000e+00 : f32
    %14 = vector.broadcast %cst_7 : f32 to vector<32x1xf32>
    %15 = arith.maximumf %13, %14 : vector<32x1xf32>
    %cst_8 = arith.constant 9.99999974E-6 : f32
    %16 = vector.broadcast %cst_8 : f32 to vector<32x1xf32>
    %17 = arith.addf %15, %16 : vector<32x1xf32>
    %18 = math.rsqrt %17 : vector<32x1xf32>
    %cst_9 = arith.constant 0.000000e+00 : f32
    %19 = vector.broadcast %cst_9 : f32 to vector<32x1xf32>
    %20 = arith.subf %19, %9 : vector<32x1xf32>
    %21 = arith.mulf %20, %18 : vector<32x1xf32>
    %22 = vector.broadcast %18 : vector<32x1xf32> to vector<32x512xf32>
    %23 = arith.mulf %2, %22 : vector<32x512xf32>
    %24 = vector.broadcast %21 : vector<32x1xf32> to vector<32x512xf32>
    %25 = arith.addf %23, %24 : vector<32x512xf32>
    %cst_10 = arith.constant 0.000000e+00 : f32
    %26 = vector.broadcast %cst_10 : f32 to vector<32x512xf32>
    %27 = arith.maximumf %25, %26 : vector<32x512xf32>
    %c32 = arith.constant 32 : index
    %c0_11 = arith.constant 0 : index
    %28 = vector.load %arg1[%c32, %c0_11] : memref<48x128xf32, #tpu.memory_space<vmem>>, vector<16x32xf32>
    %cst_12 = arith.constant dense<0.000000e+00> : vector<16x512xf32>
    %29 = tpu.matmul %28, %27, %cst_12 {dimension_numbers = #tpu.dot_dimension_numbers<[1], [0], [0], [1], [0, 0, 1, 1], [], []>} : vector<16x32xf32>, vector<32x512xf32>, vector<16x512xf32> -> vector<16x512xf32>
    %cst_13 = arith.constant dense<0.000000e+00> : vector<16xf32>
    %30 = vector.multi_reduction <add>, %29, %cst_13 [1] : vector<16x512xf32> to vector<16xf32>
    %31 = vector.shape_cast %30 : vector<16xf32> to vector<16x1xf32>
    %32 = arith.mulf %29, %29 : vector<16x512xf32>
    %cst_14 = arith.constant dense<0.000000e+00> : vector<16xf32>
    %33 = vector.multi_reduction <add>, %32, %cst_14 [1] : vector<16x512xf32> to vector<16xf32>
    %34 = vector.shape_cast %33 : vector<16xf32> to vector<16x1xf32>
    %cst_15 = arith.constant 0.001953125 : f32
    %35 = vector.broadcast %cst_15 : f32 to vector<16x1xf32>
    %36 = arith.mulf %31, %35 : vector<16x1xf32>
    %cst_16 = arith.constant 0.001953125 : f32
    %37 = vector.broadcast %cst_16 : f32 to vector<16x1xf32>
    %38 = arith.mulf %34, %37 : vector<16x1xf32>
    %39 = arith.mulf %36, %36 : vector<16x1xf32>
    %40 = arith.subf %38, %39 : vector<16x1xf32>
    %cst_17 = arith.constant 0.000000e+00 : f32
    %41 = vector.broadcast %cst_17 : f32 to vector<16x1xf32>
    %42 = arith.maximumf %40, %41 : vector<16x1xf32>
    %cst_18 = arith.constant 9.99999974E-6 : f32
    %43 = vector.broadcast %cst_18 : f32 to vector<16x1xf32>
    %44 = arith.addf %42, %43 : vector<16x1xf32>
    %45 = math.rsqrt %44 : vector<16x1xf32>
    %cst_19 = arith.constant 0.000000e+00 : f32
    %46 = vector.broadcast %cst_19 : f32 to vector<16x1xf32>
    %47 = arith.subf %46, %36 : vector<16x1xf32>
    %48 = arith.mulf %47, %45 : vector<16x1xf32>
    %49 = vector.broadcast %45 : vector<16x1xf32> to vector<16x512xf32>
    %50 = arith.mulf %29, %49 : vector<16x512xf32>
    %51 = vector.broadcast %48 : vector<16x1xf32> to vector<16x512xf32>
    %52 = arith.addf %50, %51 : vector<16x512xf32>
    %cst_20 = arith.constant 0.000000e+00 : f32
    %53 = vector.broadcast %cst_20 : f32 to vector<16x512xf32>
    %54 = arith.maximumf %52, %53 : vector<16x512xf32>
    %55 = vector.extract_strided_slice %54 {offsets = [0, 0], sizes = [16, 256], strides = [1, 1]} : vector<16x512xf32> to vector<16x256xf32>
    %c0_21 = arith.constant 0 : index
    %c0_22 = arith.constant 0 : index
    %c0_23 = arith.constant 0 : index
    %56 = vector.load %arg2[%c0_21, %c0_22, %c0_23] : memref<2x16x256xf32, #tpu.memory_space<vmem>>, vector<1x16x256xf32>
    %57 = vector.shape_cast %56 : vector<1x16x256xf32> to vector<16x256xf32>
    %58 = vector.shape_cast %55 : vector<16x256xf32> to vector<1x16x256xf32>
    tpu.vector_store %arg2[%c0_21, %c0_22, %c0_23], %58 {strides = array<i32>} : memref<2x16x256xf32, #tpu.memory_space<vmem>>, vector<1x16x256xf32>,
    %59 = vector.extract_strided_slice %54 {offsets = [0, 256], sizes = [16, 256], strides = [1, 1]} : vector<16x512xf32> to vector<16x256xf32>
    %c1 = arith.constant 1 : index
    %c0_24 = arith.constant 0 : index
    %c0_25 = arith.constant 0 : index
    %60 = vector.load %arg2[%c1, %c0_24, %c0_25] : memref<2x16x256xf32, #tpu.memory_space<vmem>>, vector<1x16x256xf32>
    %61 = vector.shape_cast %60 : vector<1x16x256xf32> to vector<16x256xf32>
    %62 = vector.shape_cast %59 : vector<16x256xf32> to vector<1x16x256xf32>
    tpu.vector_store %arg2[%c1, %c0_24, %c0_25], %62 {strides = array<i32>} : memref<2x16x256xf32, #tpu.memory_space<vmem>>, vector<1x16x256xf32>,
    return
  }
}

</mosaic_0001>

<bundles_post_ra>
// kernel: forward.1
= control target key start
LH: loop header
LB: loop body
LE: loop exit
PB: predicated region body
PF: predicated region fallthrough
CT: control target
= control target key end

     0   :  { %vm34_vm0 = vcmask 1043456   ;;  %v658_v1 = vmov 0.0   ;;  %vm21_vm1 = vcmask 31744   ;;  %vm363_vm2 = vcmask 261120   ;;  %s838_s0 = inlined_call_operand.vmem [shape: f32[4,512], index: 0, kind: input, shape index: {}]   ;;  %s839_s1 = inlined_call_operand.vmem [shape: f32[48,128], index: 1, kind: input, shape index: {}]   ;;  %s840_s2 = inlined_call_operand.vmem [shape: f32[2,16,256], index: 2, kind: output, shape index: {}]  }
   0x1   :  { %v11_v0 = vld [vmem:[%s838_s0] sm:$0xff]  ;;  %107 = vmatprep.mubr.f32.mxu0 %v658_v1  ;;  %v12_v2 = vld [vmem:[%s838_s0 + $0x8] sm:$0xff]  ;;  %196 = vmatprep.mubr.f32.mxu1 %v658_v1  ;;  %v15_v7 = vld [vmem:[%s839_s1 + $0x10] sm:$0xff] }
   0x2   :  { %v19_v3 = vcombine.high %v11_v0, %v11_v0  ;;  %v20_v4 = vcombine.high %v12_v2, %v12_v2  ;;  %v13_v5 = vld [vmem:[%s839_s1] sm:$0xff]  ;;  %v14_v6 = vld [vmem:[%s839_s1 + $0x8] sm:$0xff]  ;;  %v16_v8 = vld [vmem:[%s839_s1 + $0x18] sm:$0xff] }
   0x4   :  { %607 = vmatprep.subr.msk.mxu0 %vm34_vm0, %v19_v3  ;;  %613 = vmatprep.subr.msk.mxu1 %vm34_vm0, %v20_v4 }
   0x5   :  { %608 = vmatpush1.msk.msra.mxu0 %vm34_vm0, %v11_v0  ;;  %614 = vmatpush1.msk.msra.mxu1 %vm34_vm0, %v12_v2 }
   0x6   :  { %609 = vmatmul.mubr.msk.f32.vlgmr.msra.gmra.mrb[0].mxu0 %vm21_vm1, %v13_v5  ;;  %615 = vmatmul.mubr.msk.f32.vlgmr.msra.gmra.mrb[0].mxu1 %vm21_vm1, %v13_v5 }
   0x7   :  { %113 = vmatprep.mubr.f32.mxu0 %v658_v1  ;;  %202 = vmatprep.mubr.f32.mxu1 %v658_v1 }
   0xa   :  { %610 = vmatmul.mubr.msk.f32.gmra.mrb[2].mxu0 %vm21_vm1, %v14_v6  ;;  %616 = vmatmul.mubr.msk.f32.gmra.mrb[2].mxu1 %vm21_vm1, %v14_v6 }
   0xb   :  { %119 = vmatprep.mubr.f32.mxu0 %v658_v1  ;;  %208 = vmatprep.mubr.f32.mxu1 %v658_v1 }
   0xe   :  { %611 = vmatmul.mubr.msk.f32.gmra.mrb[4].mxu0 %vm21_vm1, %v15_v7  ;;  %617 = vmatmul.mubr.msk.f32.gmra.mrb[4].mxu1 %vm21_vm1, %v15_v7 }
   0xf   :  { %125 = vmatprep.mubr.f32.mxu0 %v658_v1  ;;  %214 = vmatprep.mubr.f32.mxu1 %v658_v1 }
  0x12   :  { %612 = vmatmul.mubr.msk.f32.gmra.mrb[6].mxu0 %vm21_vm1, %v16_v8  ;;  %618 = vmatmul.mubr.msk.f32.gmra.mrb[6].mxu1 %vm21_vm1, %v16_v8 }
  0x13   :  { %434 = vmatprep.mubr.f32.mxu0 %v658_v1  ;;  %511 = vmatprep.mubr.f32.mxu1 %v658_v1 }
  0xd9   :  { %v710_v9 = vpop.f32.mrb[0].mxu0  ;;  %v712_v10 = vpop.f32.mrb[0].mxu1 }
  0xda   :  { %v241_v11 = vmul.f32 %v710_v9, %v710_v9  ;;  %v716_v12 = vpop.f32.mrb[1].mxu0  ;;  %v718_v13 = vpop.f32.mrb[1].mxu1  ;;  %v243_v16 = vmul.f32 %v712_v10, %v712_v10 }
  0xdb   :  { %v221_v14 = vadd.f32 %v716_v12, %v710_v9  ;;  %v242_v15 = vmul.f32 %v716_v12, %v716_v12  ;;  %v244_v25 = vmul.f32 %v718_v13, %v718_v13 }
  0xdd   :  { %v726_v17 = vpop.f32.mrb[2].mxu0  ;;  %v728_v18 = vpop.f32.mrb[2].mxu1  ;;  %v222_v19 = vadd.f32 %v221_v14, %v712_v10  ;;  %v257_v20 = vadd.f32 %v242_v15, %v241_v11 }
  0xde   :  { %v245_v21 = vmul.f32 %v726_v17, %v726_v17  ;;  %v733_v22 = vpop.f32.mrb[3].mxu0  ;;  %v247_v23 = vmul.f32 %v728_v18, %v728_v18  ;;  %v737_v24 = vpop.f32.mrb[3].mxu1 }
  0xdf   :  { %v226_v26 = vadd.f32 %v733_v22, %v726_v17  ;;  %v246_v27 = vmul.f32 %v733_v22, %v733_v22  ;;  %v223_v28 = vadd.f32 %v222_v19, %v718_v13  ;;  %v258_v29 = vadd.f32 %v257_v20, %v243_v16 }
  0xe0   :  { %v248_v39 = vmul.f32 %v737_v24, %v737_v24 }
  0xe1   :  { %224 = vadd.xlane.f32.xlu0 %v223_v28  ;;  %v746_v30 = vpop.f32.mrb[4].mxu0  ;;  %v748_v31 = vpop.f32.mrb[4].mxu1  ;;  %v259_v32 = vadd.f32 %v258_v29, %v244_v25  ;;  %v227_v33 = vadd.f32 %v226_v26, %v728_v18  ;;  %v262_v34 = vadd.f32 %v246_v27, %v245_v21 }
  0xe2   :  { %v249_v35 = vmul.f32 %v746_v30, %v746_v30  ;;  %v753_v36 = vpop.f32.mrb[5].mxu0  ;;  %v251_v37 = vmul.f32 %v748_v31, %v748_v31  ;;  %v757_v38 = vpop.f32.mrb[5].mxu1 }
  0xe3   :  { %v231_v40 = vadd.f32 %v753_v36, %v746_v30  ;;  %v250_v41 = vmul.f32 %v753_v36, %v753_v36  ;;  %260 = vadd.xlane.f32.xlu1 %v259_v32  ;;  %v228_v42 = vadd.f32 %v227_v33, %v737_v24  ;;  %v263_v43 = vadd.f32 %v262_v34, %v247_v23 }
  0xe4   :  { %v252_v53 = vmul.f32 %v757_v38, %v757_v38 }
  0xe5   :  { %229 = vadd.xlane.f32.xlu0 %v228_v42  ;;  %v766_v44 = vpop.f32.mrb[6].mxu0  ;;  %v768_v45 = vpop.f32.mrb[6].mxu1  ;;  %v264_v46 = vadd.f32 %v263_v43, %v248_v39  ;;  %v232_v47 = vadd.f32 %v231_v40, %v748_v31  ;;  %v267_v48 = vadd.f32 %v250_v41, %v249_v35 }
  0xe6   :  { %v253_v49 = vmul.f32 %v766_v44, %v766_v44  ;;  %v773_v50 = vpop.f32.mrb[7].mxu0  ;;  %v255_v51 = vmul.f32 %v768_v45, %v768_v45  ;;  %v777_v52 = vpop.f32.mrb[7].mxu1 }
  0xe7   :  { %v236_v54 = vadd.f32 %v773_v50, %v766_v44  ;;  %v254_v55 = vmul.f32 %v773_v50, %v773_v50  ;;  %265 = vadd.xlane.f32.xlu1 %v264_v46  ;;  %v233_v56 = vadd.f32 %v232_v47, %v757_v38  ;;  %v268_v57 = vadd.f32 %v267_v48, %v251_v37 }
  0xe8   :  { %v256_v62 = vmul.f32 %v777_v52, %v777_v52 }
  0xe9   :  { %234 = vadd.xlane.f32.xlu0 %v233_v56  ;;  %v269_v58 = vadd.f32 %v268_v57, %v252_v53  ;;  %v237_v59 = vadd.f32 %v236_v54, %v768_v45  ;;  %v272_v60 = vadd.f32 %v254_v55, %v253_v49 }
  0xeb   :  { %v238_v61 = vadd.f32 %v237_v59, %v777_v52  ;;  %v273_v63 = vadd.f32 %v272_v60, %v255_v51 }
  0xed   :  { %270 = vadd.xlane.f32.xlu0 %v269_v58  ;;  %239 = vadd.xlane.f32.xlu1 %v238_v61  ;;  %v274_v0 = vadd.f32 %v273_v63, %v256_v62 }
  0xf1   :  { %275 = vadd.xlane.f32.xlu1 %v274_v0 }
 0x16e   :  { %v225_v2 = vpop.xlane.xlu0 %224 }
 0x16f   :  { %v277_v3 = vmul.f32 0.001953125, %v225_v2 }
 0x170   :  { %v261_v4 = vpop.xlane.xlu1 %260 }
 0x171   :  { %v285_v5 = vmul.f32 %v277_v3, %v277_v3  ;;  %v281_v6 = vmul.f32 0.001953125, %v261_v4  ;;  %v305_v46 = vsub.f32 0.0, %v277_v3 }
 0x172   :  { %v230_v7 = vpop.xlane.xlu0 %229 }
 0x173   :  { %v289_v8 = vsub.f32 %v281_v6, %v285_v5  ;;  %v278_v11 = vmul.f32 0.001953125, %v230_v7 }
 0x174   :  { %v266_v14 = vpop.xlane.xlu1 %265 }
 0x175   :  { %v293_v15 = vmax.f32 %v289_v8, 0.0  ;;  %v286_v16 = vmul.f32 %v278_v11, %v278_v11  ;;  %v282_v19 = vmul.f32 0.001953125, %v266_v14  ;;  %v306_v57 = vsub.f32 0.0, %v278_v11 }
 0x176   :  { %v235_v20 = vpop.xlane.xlu0 %234 }
 0x177   :  { %v297_v21 = vadd.f32 1e-05, %v293_v15  ;;  %v290_v23 = vsub.f32 %v282_v19, %v286_v16  ;;  %v279_v25 = vmul.f32 0.001953125, %v235_v20 }
 0x179   :  { %646 = vrsqrt.f32 %v297_v21  ;;  %v294_v26 = vmax.f32 %v290_v23, 0.0  ;;  %v287_v32 = vmul.f32 %v279_v25, %v279_v25  ;;  %v307_v4 = vsub.f32 0.0, %v279_v25 }
 0x17a   :  { %v271_v27 = vpop.xlane.xlu0 %270  ;;  %v240_v28 = vpop.xlane.xlu1 %239 }
 0x17b   :  { %v298_v29 = vadd.f32 1e-05, %v294_v26  ;;  %v283_v33 = vmul.f32 0.001953125, %v271_v27  ;;  %v280_v34 = vmul.f32 0.001953125, %v240_v28 }
 0x17d   :  { %648 = vrsqrt.f32 %v298_v29  ;;  %v291_v35 = vsub.f32 %v283_v33, %v287_v32  ;;  %v288_v40 = vmul.f32 %v280_v34, %v280_v34  ;;  %v308_v27 = vsub.f32 0.0, %v280_v34 }
 0x17e   :  { %v276_v37 = vpop.xlane.xlu1 %275 }
 0x17f   :  { %v295_v39 = vmax.f32 %v291_v35, 0.0  ;;  %v284_v41 = vmul.f32 0.001953125, %v276_v37 }
 0x181   :  { %v299_v42 = vadd.f32 1e-05, %v295_v39  ;;  %v292_v43 = vsub.f32 %v284_v41, %v288_v40 }
 0x183   :  { %v647_v47 = vpop.eup %646  ;;  %650 = vrsqrt.f32 %v299_v42  ;;  %v296_v48 = vmax.f32 %v292_v43, 0.0 }
 0x184   :  { %v309_v49 = vmul.f32 %v647_v47, %v305_v46  ;;  %v314_v51 = vmul.f32 %v647_v47, %v716_v12  ;;  %v316_v53 = vmul.f32 %v647_v47, %v718_v13  ;;  %v313_v55 = vmul.f32 %v647_v47, %v710_v9 }
 0x185   :  { %v300_v54 = vadd.f32 1e-05, %v296_v48  ;;  %v315_v56 = vmul.f32 %v647_v47, %v712_v10 }
 0x186   :  { %v330_v59 = vadd.f32 %v314_v51, %v309_v49  ;;  %v332_v63 = vadd.f32 %v316_v53, %v309_v49  ;;  %v329_v12 = vadd.f32 %v313_v55, %v309_v49 }
 0x187   :  { %v649_v58 = vpop.eup %648  ;;  %652 = vrsqrt.f32 %v300_v54  ;;  %v331_v2 = vadd.f32 %v315_v56, %v309_v49  ;;  %v362_v56 = vld [vmem:[%s839_s1 + $0x28] sm:$0xff] }
 0x188   :  { %v310_v60 = vmul.f32 %v649_v58, %v306_v57  ;;  %v318_v61 = vmul.f32 %v649_v58, %v733_v22  ;;  %v320_v62 = vmul.f32 %v649_v58, %v737_v24  ;;  %v317_v0 = vmul.f32 %v649_v58, %v726_v17 }
 0x189   :  { %v319_v13 = vmul.f32 %v649_v58, %v728_v18  ;;  %v346_v6 = vmax.f32 %v330_v59, 0.0  ;;  %v348_v8 = vmax.f32 %v332_v63, 0.0  ;;  %v345_v22 = vmax.f32 %v329_v12, 0.0 }
 0x18a   :  { %v334_v3 = vadd.f32 %v318_v61, %v310_v60  ;;  %v336_v9 = vadd.f32 %v320_v62, %v310_v60  ;;  %v333_v10 = vadd.f32 %v317_v0, %v310_v60  ;;  %v347_v24 = vmax.f32 %v331_v2, 0.0 }
 0x18b   :  { %v335_v5 = vadd.f32 %v319_v13, %v310_v60 }
 0x18c   :  { %v350_v7 = vmax.f32 %v334_v3, 0.0  ;;  %v352_v11 = vmax.f32 %v336_v9, 0.0  ;;  %v349_v15 = vmax.f32 %v333_v10, 0.0 }
 0x18d   :  { %v651_v14 = vpop.eup %650  ;;  %v351_v16 = vmax.f32 %v335_v5, 0.0 }
 0x18e   :  { %v627_v19 = vpack.c.bf16 %v350_v7, %v346_v6  ;;  %v635_v17 = vpack.c.bf16 %v352_v11, %v348_v8  ;;  %v311_v20 = vmul.f32 %v651_v14, %v307_v4  ;;  %v322_v18 = vmul.f32 %v651_v14, %v753_v36 }
 0x18f   :  { %v629_v21 = vpack.c.bf16 %v349_v15, %v345_v22  ;;  %v637_v23 = vpack.c.bf16 %v351_v16, %v347_v24  ;;  %v324_v25 = vmul.f32 %v651_v14, %v757_v38  ;;  %v321_v26 = vmul.f32 %v651_v14, %v746_v30 }
 0x190   :  { %628 = vmatprep.subr.bf16.mxu0 %v627_v19  ;;  %636 = vmatprep.subr.bf16.mxu1 %v635_v17  ;;  %v323_v28 = vmul.f32 %v651_v14, %v748_v31  ;;  %v338_v32 = vadd.f32 %v322_v18, %v311_v20 }
 0x191   :  { %v653_v29 = vpop.eup %652  ;;  %630 = vmatpush1.bf16.msra.mxu0 %v629_v21  ;;  %638 = vmatpush1.bf16.msra.mxu1 %v637_v23  ;;  %v340_v37 = vadd.f32 %v324_v25, %v311_v20  ;;  %v337_v38 = vadd.f32 %v321_v26, %v311_v20 }
 0x192   :  { %v312_v33 = vmul.f32 %v653_v29, %v308_v27  ;;  %v326_v35 = vmul.f32 %v653_v29, %v773_v50  ;;  %v328_v36 = vmul.f32 %v653_v29, %v777_v52  ;;  %v325_v39 = vmul.f32 %v653_v29, %v766_v44 }
 0x193   :  { %v327_v30 = vmul.f32 %v653_v29, %v768_v45  ;;  %v339_v41 = vadd.f32 %v323_v28, %v311_v20  ;;  %v354_v43 = vmax.f32 %v338_v32, 0.0  ;;  %v356_v47 = vmax.f32 %v340_v37, 0.0  ;;  %v361_v45 = vld [vmem:[%s839_s1 + $0x20] sm:$0xff] }
 0x194   :  { %v342_v34 = vadd.f32 %v326_v35, %v312_v33  ;;  %v344_v40 = vadd.f32 %v328_v36, %v312_v33  ;;  %v341_v42 = vadd.f32 %v325_v39, %v312_v33  ;;  %v353_v49 = vmax.f32 %v337_v38, 0.0 }
 0x195   :  { %v343_v31 = vadd.f32 %v327_v30, %v312_v33  ;;  %v355_v50 = vmax.f32 %v339_v41, 0.0 }
 0x196   :  { %v358_v46 = vmax.f32 %v342_v34, 0.0  ;;  %v360_v48 = vmax.f32 %v344_v40, 0.0  ;;  %v357_v51 = vmax.f32 %v341_v42, 0.0 }
 0x197   :  { %v359_v53 = vmax.f32 %v343_v31, 0.0 }
 0x198   :  { %v631_v52 = vpack.c.bf16 %v358_v46, %v354_v43  ;;  %v639_v54 = vpack.c.bf16 %v360_v48, %v356_v47  ;;  %v633_v55 = vpack.c.bf16 %v357_v51, %v353_v49 }
 0x199   :  { %v641_v44 = vpack.c.bf16 %v359_v53, %v355_v50 }
 0x19a   :  { %632 = vmatprep.subr.bf16.mxu0 %v631_v52  ;;  %640 = vmatprep.subr.bf16.mxu1 %v639_v54 }
 0x19b   :  { %634 = vmatpush1.bf16.msra.mxu0 %v633_v55  ;;  %642 = vmatpush1.bf16.msra.mxu1 %v641_v44 }
 0x19e   :  { %619 = vmatmul.mubr.msk.f32.vlgmr.msra.gmra.mrb[8].mxu0 %vm363_vm2, %v361_v45  ;;  %621 = vmatmul.mubr.msk.f32.vlgmr.msra.gmra.mrb[8].mxu1 %vm363_vm2, %v361_v45 }
 0x19f   :  { %440 = vmatprep.mubr.f32.mxu0 %v658_v1  ;;  %517 = vmatprep.mubr.f32.mxu1 %v658_v1 }
 0x1a2   :  { %620 = vmatmul.mubr.msk.f32.gmra.mrb[10].mxu0 %vm363_vm2, %v362_v56  ;;  %622 = vmatmul.mubr.msk.f32.gmra.mrb[10].mxu1 %vm363_vm2, %v362_v56 }
 0x271   :  { %v436_v57 = vpop.f32.mrb[8].mxu0  ;;  %v513_v58 = vpop.f32.mrb[8].mxu1 }
 0x272   :  { %v534_v59 = vmul.f32 %v436_v57, %v436_v57  ;;  %v438_v60 = vpop.f32.mrb[9].mxu0  ;;  %v515_v61 = vpop.f32.mrb[9].mxu1  ;;  %v536_v0 = vmul.f32 %v513_v58, %v513_v58 }
 0x273   :  { %v524_v62 = vadd.f32 %v438_v60, %v436_v57  ;;  %v535_v63 = vmul.f32 %v438_v60, %v438_v60  ;;  %v537_v8 = vmul.f32 %v515_v61, %v515_v61 }
 0x275   :  { %v442_v12 = vpop.f32.mrb[10].mxu0  ;;  %v519_v13 = vpop.f32.mrb[10].mxu1  ;;  %v525_v2 = vadd.f32 %v524_v62, %v513_v58  ;;  %v542_v3 = vadd.f32 %v535_v63, %v534_v59 }
 0x276   :  { %v538_v9 = vmul.f32 %v442_v12, %v442_v12  ;;  %v444_v4 = vpop.f32.mrb[11].mxu0  ;;  %v521_v10 = vpop.f32.mrb[11].mxu1  ;;  %v540_v1 = vmul.f32 %v519_v13, %v519_v13 }
 0x277   :  { %v529_v5 = vadd.f32 %v444_v4, %v442_v12  ;;  %v539_v6 = vmul.f32 %v444_v4, %v444_v4  ;;  %v526_v7 = vadd.f32 %v525_v2, %v515_v61  ;;  %v543_v11 = vadd.f32 %v542_v3, %v536_v0 }
 0x278   :  { %v541_v24 = vmul.f32 %v521_v10, %v521_v10 }
 0x279   :  { %v547_v14 = vadd.f32 %v539_v6, %v538_v9  ;;  %527 = vadd.xlane.f32.xlu0 %v526_v7  ;;  %v530_v22 = vadd.f32 %v529_v5, %v519_v13  ;;  %v544_v15 = vadd.f32 %v543_v11, %v537_v8 }
 0x27b   :  { %v531_v16 = vadd.f32 %v530_v22, %v521_v10  ;;  %v548_v19 = vadd.f32 %v547_v14, %v540_v1 }
 0x27d   :  { %545 = vadd.xlane.f32.xlu0 %v544_v15  ;;  %532 = vadd.xlane.f32.xlu1 %v531_v16  ;;  %v549_v17 = vadd.f32 %v548_v19, %v541_v24 }
 0x281   :  { %550 = vadd.xlane.f32.xlu1 %v549_v17 }
 0x306   :  { %v528_v20 = vpop.xlane.xlu0 %527 }
 0x307   :  { %v552_v18 = vmul.f32 0.001953125, %v528_v20 }
 0x309   :  { %v556_v25 = vmul.f32 %v552_v18, %v552_v18  ;;  %v566_v30 = vsub.f32 0.0, %v552_v18 }
 0x30a   :  { %v546_v21 = vpop.xlane.xlu0 %545  ;;  %v533_v23 = vpop.xlane.xlu1 %532 }
 0x30b   :  { %v554_v26 = vmul.f32 0.001953125, %v546_v21  ;;  %v553_v27 = vmul.f32 0.001953125, %v533_v23 }
 0x30d   :  { %v558_v28 = vsub.f32 %v554_v26, %v556_v25  ;;  %v557_v33 = vmul.f32 %v553_v27, %v553_v27  ;;  %v567_v49 = vsub.f32 0.0, %v553_v27 }
 0x30e   :  { %v551_v29 = vpop.xlane.xlu1 %550 }
 0x30f   :  { %v560_v32 = vmax.f32 %v558_v28, 0.0  ;;  %v555_v35 = vmul.f32 0.001953125, %v551_v29 }
 0x311   :  { %v562_v36 = vadd.f32 1e-05, %v560_v32  ;;  %v559_v37 = vsub.f32 %v555_v35, %v557_v33 }
 0x313   :  { %654 = vrsqrt.f32 %v562_v36  ;;  %v561_v39 = vmax.f32 %v559_v37, 0.0 }
 0x315   :  { %v563_v38 = vadd.f32 1e-05, %v561_v39 }
 0x317   :  { %656 = vrsqrt.f32 %v563_v38 }
 0x31d   :  { %v655_v34 = vpop.eup %654 }
 0x31e   :  { %v568_v40 = vmul.f32 %v655_v34, %v566_v30  ;;  %v570_v41 = vmul.f32 %v655_v34, %v436_v57  ;;  %v571_v42 = vmul.f32 %v655_v34, %v438_v60  ;;  %v572_v31 = vmul.f32 %v655_v34, %v513_v58 }
 0x31f   :  { %v573_v43 = vmul.f32 %v655_v34, %v515_v61 }
 0x320   :  { %v578_v46 = vadd.f32 %v570_v41, %v568_v40  ;;  %v579_v47 = vadd.f32 %v571_v42, %v568_v40  ;;  %v580_v48 = vadd.f32 %v572_v31, %v568_v40 }
 0x321   :  { %v657_v51 = vpop.eup %656  ;;  %v581_v50 = vadd.f32 %v573_v43, %v568_v40 }
 0x322   :  { %v586_v53 = vmax.f32 %v578_v46, 0.0  ;;  %v587_v52 = vmax.f32 %v579_v47, 0.0  ;;  %v588_v54 = vmax.f32 %v580_v48, 0.0  ;;  %v569_v55 = vmul.f32 %v657_v51, %v567_v49 }
 0x323   :  { %v589_v44 = vmax.f32 %v581_v50, 0.0  ;;  %v574_v45 = vmul.f32 %v657_v51, %v442_v12  ;;  %v575_v56 = vmul.f32 %v657_v51, %v444_v4  ;;  %v576_v59 = vmul.f32 %v657_v51, %v519_v13 }
 0x324   :  { %594 = vst [vmem:[%s840_s2] sm:$0xff] %v586_v53  ;;  %595 = vst [vmem:[%s840_s2 + $0x8] sm:$0xff] %v587_v52  ;;  %v577_v57 = vmul.f32 %v657_v51, %v521_v10 }
 0x325   :  { %623 = vst [vmem:[%s840_s2 + $0x20] sm:$0xff] %v588_v54  ;;  %624 = vst [vmem:[%s840_s2 + $0x28] sm:$0xff] %v589_v44  ;;  %v582_v58 = vadd.f32 %v574_v45, %v569_v55  ;;  %v583_v60 = vadd.f32 %v575_v56, %v569_v55  ;;  %v584_v61 = vadd.f32 %v576_v59, %v569_v55 }
 0x326   :  { %v585_v62 = vadd.f32 %v577_v57, %v569_v55 }
 0x327   :  { %v590_v63 = vmax.f32 %v582_v58, 0.0  ;;  %v591_v0 = vmax.f32 %v583_v60, 0.0  ;;  %v592_v12 = vmax.f32 %v584_v61, 0.0 }
 0x328   :  { %v593_v13 = vmax.f32 %v585_v62, 0.0 }
 0x329   :  { %596 = vst [vmem:[%s840_s2 + $0x10] sm:$0xff] %v590_v63  ;;  %597 = vst [vmem:[%s840_s2 + $0x18] sm:$0xff] %v591_v0 }
 0x32a   :  { %625 = vst [vmem:[%s840_s2 + $0x30] sm:$0xff] %v592_v12  ;;  %626 = vst [vmem:[%s840_s2 + $0x38] sm:$0xff] %v593_v13 }

</bundles_post_ra>
